<compile_context>
chip_gen: v6e
topology: v6e:2x2x1
jax: 0.10.0
libtpu: 0.0.40
codegen_flags: <defaults>
</compile_context>

<pallas_src>
import functools

import jax
import jax.numpy as jnp
from jax import lax
from jax.experimental import pallas as pl
from jax.experimental.pallas import tpu as pltpu

BN_EPS = 1e-5
LANE = 128
SUBLANE = 8


def _round_up(x, m):
    return (x + m - 1) // m * m


def _default_vmem_limit():
    # v5e/v6e have 128 MiB physical VMEM -> allow up to 96 MiB scoped;
    # v7x has 64 MiB -> 48 MiB.  Fallback assumes the smaller chip.
    try:
        cap = pltpu.get_tpu_info().vmem_capacity_bytes
    except Exception:
        cap = 64 << 20
    return int(min(cap * 3 // 4, 96 << 20))


_VMEM_LIMIT = _default_vmem_limit()


# --------------------------------------------------------------------------
# Pass 1: conv via K*K shifted matmuls + per-image BN partial statistics
# --------------------------------------------------------------------------
def _make_conv_stats_kernel(k, wi, m_flat, inv_cnt):
    """k: filter size, wi: input width, m_flat = Ho*Wi (flat output incl. the
    K-1 wrap columns per row), inv_cnt = 1/(Ho*Wo) for the per-image mean."""
    kk = k * k

    def kernel(x_ref, w_ref, mask_ref, y_ref, psum_ref, pm2_ref, acc_ref):
        # x_ref   : (1, Cin_p, HWpad)   compute dtype  (row-flattened image)
        # w_ref   : (K*K, CP, Cin_p)    compute dtype  (resident weights)
        # mask_ref: (1, m_flat)         f32   (1 on valid cols, 0 on wrap cols)
        # y_ref   : (1, CP, m_flat)     compute dtype  (conv output, ch-major)
        # psum_ref, pm2_ref : (1, CP, 1) f32  (per-image partial stats)
        # acc_ref : (CP, m_flat)        f32   scratch accumulator
        for idx in range(kk):
            di, dj = idx // k, idx % k
            off = di * wi + dj
            slab = x_ref[0, :, off:off + m_flat]            # (Cin_p, M)
            contrib = jnp.dot(w_ref[idx], slab,
                              preferred_element_type=jnp.float32)
            if idx == 0:
                acc_ref[...] = contrib
            else:
                acc_ref[...] += contrib

        acc = acc_ref[...]                                   # (CP, M) f32
        # Store the conv output in the compute dtype (bf16 by default); the
        # statistics below come from the f32 accumulator, so they are exact.
        y_ref[0] = acc.astype(y_ref.dtype)

        mask = mask_ref[...]                                 # (1, M)
        s = jnp.sum(acc * mask, axis=1, keepdims=True)       # (CP, 1)
        mean = s * inv_cnt
        d = (acc - mean) * mask
        m2 = jnp.sum(d * d, axis=1, keepdims=True)           # (CP, 1)
        psum_ref[0] = s
        pm2_ref[0] = m2

    return kernel


# --------------------------------------------------------------------------
# Pass 2: folded BatchNorm (per-channel scale/shift) + ReLU, channel-major
# --------------------------------------------------------------------------
def _bn_relu_kernel(y_ref, scale_ref, shift_ref, o_ref):
    y = y_ref[0].astype(jnp.float32)                         # (CP, M)
    o_ref[0] = jnp.maximum(y * scale_ref[...] + shift_ref[...], 0.0)


# --------------------------------------------------------------------------
# Host-side glue
# --------------------------------------------------------------------------
@functools.partial(jax.jit, static_argnames=("compute_dtype",))
def conv_bn_relu_block(x_nchw, weight, bias, gamma, beta, *,
                       compute_dtype=jnp.bfloat16):
    """Forward pass of _ConvBNReluBlock (training-mode BN).

    x_nchw : (N, Cin, H, W) f32
    weight : (Cout, Cin, K, K) PyTorch Conv2d layout
    bias   : (Cout,)  (cancelled exactly by training-mode BN centering)
    gamma, beta : (Cout,) BN affine params
    returns: (N, Cout, H-K+1, W-K+1) f32
    """
    # Training-mode BN subtracts the per-channel batch mean -> the conv bias
    # cancels exactly.  (If eval-mode / running stats were ever used, the bias
    # would have to be added back.)
    del bias

    n, cin, hi, wi = x_nchw.shape
    cout, cin2, kh, kw = weight.shape
    assert cin == cin2 and kh == kw, "square kernel / channel mismatch"
    k = kh
    ho, wo = hi - k + 1, wi - k + 1
    assert ho > 0 and wo > 0, "kernel larger than input"

    m_flat = ho * wi                         # flat output per image (Ho full W
    #                                          rows; the last K-1 cols per row
    #                                          are wrap garbage, masked/cropped)
    cp = _round_up(cout, SUBLANE)            # 8-padded output channels
    cin_p = _round_up(cin, SUBLANE)          # 8-padded input channels
    hw_pad = _round_up(hi * wi + k - 1, LANE)

    # ---- operand prep (cheap single XLA passes; no K^2 im2col slab) --------
    xf = jnp.zeros((n, cin_p, hw_pad), compute_dtype)
    xf = xf.at[:, :cin, :hi * wi].set(
        x_nchw.reshape(n, cin, hi * wi).astype(compute_dtype))

    w_all = jnp.transpose(weight, (2, 3, 0, 1)).reshape(k * k, cout, cin)
    w_p = jnp.zeros((k * k, cp, cin_p), compute_dtype)
    w_p = w_p.at[:, :cout, :cin].set(w_all.astype(compute_dtype))

    col = jnp.arange(m_flat, dtype=jnp.int32)
    mask = ((col % wi) < wo).astype(jnp.float32).reshape(1, m_flat)

    itemsz = jnp.dtype(compute_dtype).itemsize

    # ---------------- pass 1: conv matmuls + per-image partial stats --------
    # TODO(synk): for images where (Cin*H*W + Cout*Ho*W) exceeds the VMEM
    # budget, tile H with a manual halo DMA (pl.ANY + make_async_copy) instead
    # of whole-image blocks; optionally also tile Cin.
    # TODO(synk): single-buffer the resident weight block
    # (pipeline_mode=pl.Buffered(1)) once buffer_count=1 is validated.
    kern1 = _make_conv_stats_kernel(k, wi, m_flat, 1.0 / float(ho * wo))
    y, psum, pm2 = pl.pallas_call(
        kern1,
        out_shape=(
            jax.ShapeDtypeStruct((n, cp, m_flat), compute_dtype),
            jax.ShapeDtypeStruct((n, cp, 1), jnp.float32),
            jax.ShapeDtypeStruct((n, cp, 1), jnp.float32),
        ),
        grid_spec=pltpu.PrefetchScalarGridSpec(
            num_scalar_prefetch=0,
            grid=(n,),
            in_specs=[
                pl.BlockSpec((1, cin_p, hw_pad), lambda b: (b, 0, 0)),
                pl.BlockSpec((k * k, cp, cin_p), lambda b: (0, 0, 0)),
                pl.BlockSpec((1, m_flat), lambda b: (0, 0)),
            ],
            out_specs=[
                pl.BlockSpec((1, cp, m_flat), lambda b: (b, 0, 0)),
                pl.BlockSpec((1, cp, 1), lambda b: (b, 0, 0)),
                pl.BlockSpec((1, cp, 1), lambda b: (b, 0, 0)),
            ],
            scratch_shapes=[pltpu.VMEM((cp, m_flat), jnp.float32)],
        ),
        compiler_params=pltpu.CompilerParams(
            dimension_semantics=("parallel",),      # per-image, no accumulator
            vmem_limit_bytes=_VMEM_LIMIT),
        cost_estimate=pl.CostEstimate(
            flops=2 * n * k * k * cp * cin_p * m_flat,
            transcendentals=0,
            bytes_accessed=(n * cin_p * hw_pad * itemsz
                            + k * k * cp * cin_p * itemsz
                            + n * cp * m_flat * itemsz)),
    )(xf, w_p, mask)

    # ---- merge per-image partial stats (Chan) -> folded scale/shift --------
    cnt = float(ho * wo)
    total = float(n) * cnt
    psum2 = psum[:, :, 0]                          # (N, CP)
    pm22 = pm2[:, :, 0]                            # (N, CP)
    gsum = jnp.sum(psum2, axis=0)                  # (CP,)
    gmean = gsum / total
    mean_i = psum2 / cnt
    gm2 = jnp.sum(pm22, axis=0) + cnt * jnp.sum(
        (mean_i - gmean[None, :]) ** 2, axis=0)
    var = jnp.maximum(gm2 / total, 0.0)            # biased batch variance
    inv_std = lax.rsqrt(var + BN_EPS)
    gamma_p = jnp.zeros((cp,), jnp.float32).at[:cout].set(
        gamma.astype(jnp.float32))
    beta_p = jnp.zeros((cp,), jnp.float32).at[:cout].set(
        beta.astype(jnp.float32))
    scale = (gamma_p * inv_std).reshape(cp, 1)
    shift = (beta_p - gmean * gamma_p * inv_std).reshape(cp, 1)

    # ---------------- pass 2: y*scale + shift, ReLU (channel-major) ---------
    # TODO(synk): fuse this pass into the consumer of the block (or emit bf16)
    # to drop its separate HBM read+write.
    out_flat = pl.pallas_call(
        _bn_relu_kernel,
        out_shape=jax.ShapeDtypeStruct((n, cp, m_flat), jnp.float32),
        grid_spec=pltpu.PrefetchScalarGridSpec(
            num_scalar_prefetch=0,
            grid=(n,),
            in_specs=[
                pl.BlockSpec((1, cp, m_flat), lambda b: (b, 0, 0)),
                pl.BlockSpec((cp, 1), lambda b: (0, 0)),
                pl.BlockSpec((cp, 1), lambda b: (0, 0)),
            ],
            out_specs=pl.BlockSpec((1, cp, m_flat), lambda b: (b, 0, 0)),
        ),
        compiler_params=pltpu.CompilerParams(
            dimension_semantics=("parallel",),
            vmem_limit_bytes=_VMEM_LIMIT),
        cost_estimate=pl.CostEstimate(
            flops=2 * n * cp * m_flat,
            transcendentals=0,
            bytes_accessed=n * cp * m_flat * (itemsz + 4)),
    )(y, scale, shift)

    # Epilogue: already channel-major (NCHW-ordered), so no minor-dim
    # transpose remains -- just crop padded channels and the K-1 wrap columns.
    out = out_flat[:, :cout, :].reshape(n, cout, ho, wi)[:, :, :, :wo]
    return out


# --------------------------------------------------------------------------
# Pure-JAX reference (Conv2d + bias, training-mode BN, ReLU)
# --------------------------------------------------------------------------
def _reference(x_nchw, weight, bias, gamma, beta):
    y = lax.conv_general_dilated(
        x_nchw, weight, window_strides=(1, 1), padding="VALID",
        dimension_numbers=("NCHW", "OIHW", "NCHW"))
    y = y + bias[None, :, None, None]
    mean = jnp.mean(y, axis=(0, 2, 3), keepdims=True)
    var = jnp.mean((y - mean) ** 2, axis=(0, 2, 3), keepdims=True)
    y = (y - mean) * lax.rsqrt(var + BN_EPS)
    y = y * gamma[None, :, None, None] + beta[None, :, None, None]
    return jnp.maximum(y, 0.0)


if __name__ == "__main__":
    # Small deterministic example: in_ch=4, out_ch=8, kernel_size=3, x:(2,4,16,16)
    in_ch, out_ch, ksize = 4, 8, 3
    key = jax.random.PRNGKey(0)
    kx, kw, kb, kg, kbt = jax.random.split(key, 5)

    x = jax.random.normal(kx, (2, in_ch, 16, 16), dtype=jnp.float32)
    fan_in = in_ch * ksize * ksize
    weight = jax.random.normal(kw, (out_ch, in_ch, ksize, ksize),
                               dtype=jnp.float32) * (1.0 / jnp.sqrt(fan_in))
    bias = jax.random.normal(kb, (out_ch,), dtype=jnp.float32) * 0.1
    gamma = 1.0 + 0.1 * jax.random.normal(kg, (out_ch,), dtype=jnp.float32)
    beta = 0.1 * jax.random.normal(kbt, (out_ch,), dtype=jnp.float32)

    # Pre-round conv operands to bf16-representable values so the kernel's
    # bf16 MXU path and the f32 reference see identical operands; the only
    # remaining difference is the bf16 rounding of the stored intermediate y.
    x = x.astype(jnp.bfloat16).astype(jnp.float32)
    weight = weight.astype(jnp.bfloat16).astype(jnp.float32)

    out = conv_bn_relu_block(x, weight, bias, gamma, beta)
    out = jax.block_until_ready(out)

    ref = jax.block_until_ready(_reference(x, weight, bias, gamma, beta))
    assert out.shape == (2, out_ch, 14, 14), out.shape
    err = float(jnp.max(jnp.abs(out - ref)))
    # Tolerance accounts for the bf16-stored intermediate conv output.
    assert jnp.allclose(out, ref, atol=3e-2, rtol=3e-2), err

    print("KERNEL_OK")
</pallas_src>

<mosaic_0001>
module attributes {stable_mosaic.version = 11 : i64} {
  func.func @kernel(%arg0: i32, %arg1: memref<1x8x384xbf16, #tpu.memory_space<vmem>>, %arg2: memref<9x8x8xbf16, #tpu.memory_space<vmem>>, %arg3: memref<1x224xf32, #tpu.memory_space<vmem>>, %arg4: memref<1x8x224xbf16, #tpu.memory_space<vmem>>, %arg5: memref<1x8x1xf32, #tpu.memory_space<vmem>>, %arg6: memref<1x8x1xf32, #tpu.memory_space<vmem>>, %arg7: memref<8x224xf32, #tpu.memory_space<vmem>>) attributes {dimension_semantics = [#tpu.dimension_semantics<parallel>], iteration_bounds = array<i64: 2>, scalar_prefetch = 0 : i64, scratch_operands = 1 : i64, tpu.core_type = #tpu.core_type<tc>, window_params = [{transform_indices = @transform_0, window_bounds = array<i64: 1, 8, 384>}, {pipeline_mode = #tpu.pipeline_mode<synchronous>, transform_indices = @transform_1, window_bounds = array<i64: 9, 8, 8>}, {pipeline_mode = #tpu.pipeline_mode<synchronous>, transform_indices = @transform_2, window_bounds = array<i64: 1, 224>}, {transform_indices = @transform_3, window_bounds = array<i64: 1, 8, 224>}, {transform_indices = @transform_4, window_bounds = array<i64: 1, 8, 1>}, {transform_indices = @transform_5, window_bounds = array<i64: 1, 8, 1>}]} {
    %c0 = arith.constant 0 : index
    %c0_0 = arith.constant 0 : index
    %c0_1 = arith.constant 0 : index
    %0 = vector.load %arg1[%c0, %c0_0, %c0_1] : memref<1x8x384xbf16, #tpu.memory_space<vmem>>, vector<1x8x224xbf16>
    %1 = vector.shape_cast %0 : vector<1x8x224xbf16> to vector<8x224xbf16>
    %c0_2 = arith.constant 0 : index
    %c0_3 = arith.constant 0 : index
    %c0_4 = arith.constant 0 : index
    %2 = vector.load %arg2[%c0_2, %c0_3, %c0_4] : memref<9x8x8xbf16, #tpu.memory_space<vmem>>, vector<1x8x8xbf16>
    %3 = vector.shape_cast %2 : vector<1x8x8xbf16> to vector<8x8xbf16>
    %cst = arith.constant dense<0.000000e+00> : vector<8x224xf32>
    %4 = tpu.matmul %3, %1, %cst {dimension_numbers = #tpu.dot_dimension_numbers<[1], [0], [0], [1], [0, 0, 1, 1], [], []>} : vector<8x8xbf16>, vector<8x224xbf16>, vector<8x224xf32> -> vector<8x224xf32>
    %c0_5 = arith.constant 0 : index
    %c0_6 = arith.constant 0 : index
    %5 = vector.load %arg7[%c0_5, %c0_6] : memref<8x224xf32, #tpu.memory_space<vmem>>, vector<8x224xf32>
    tpu.vector_store %arg7[%c0_5, %c0_6], %4 {strides = array<i32>} : memref<8x224xf32, #tpu.memory_space<vmem>>, vector<8x224xf32>,
    %c0_7 = arith.constant 0 : index
    %c0_8 = arith.constant 0 : index
    %c1 = arith.constant 1 : index
    %6 = vector.load %arg1[%c0_7, %c0_8, %c1] : memref<1x8x384xbf16, #tpu.memory_space<vmem>>, vector<1x8x224xbf16>
    %7 = vector.shape_cast %6 : vector<1x8x224xbf16> to vector<8x224xbf16>
    %c1_9 = arith.constant 1 : index
    %c0_10 = arith.constant 0 : index
    %c0_11 = arith.constant 0 : index
    %8 = vector.load %arg2[%c1_9, %c0_10, %c0_11] : memref<9x8x8xbf16, #tpu.memory_space<vmem>>, vector<1x8x8xbf16>
    %9 = vector.shape_cast %8 : vector<1x8x8xbf16> to vector<8x8xbf16>
    %cst_12 = arith.constant dense<0.000000e+00> : vector<8x224xf32>
    %10 = tpu.matmul %9, %7, %cst_12 {dimension_numbers = #tpu.dot_dimension_numbers<[1], [0], [0], [1], [0, 0, 1, 1], [], []>} : vector<8x8xbf16>, vector<8x224xbf16>, vector<8x224xf32> -> vector<8x224xf32>
    %c0_13 = arith.constant 0 : index
    %c0_14 = arith.constant 0 : index
    %11 = vector.load %arg7[%c0_13, %c0_14] : memref<8x224xf32, #tpu.memory_space<vmem>>, vector<8x224xf32>
    %12 = arith.addf %11, %10 : vector<8x224xf32>
    %c0_15 = arith.constant 0 : index
    %c0_16 = arith.constant 0 : index
    %13 = vector.load %arg7[%c0_15, %c0_16] : memref<8x224xf32, #tpu.memory_space<vmem>>, vector<8x224xf32>
    tpu.vector_store %arg7[%c0_15, %c0_16], %12 {strides = array<i32>} : memref<8x224xf32, #tpu.memory_space<vmem>>, vector<8x224xf32>,
    %c0_17 = arith.constant 0 : index
    %c0_18 = arith.constant 0 : index
    %c2 = arith.constant 2 : index
    %14 = vector.load %arg1[%c0_17, %c0_18, %c2] : memref<1x8x384xbf16, #tpu.memory_space<vmem>>, vector<1x8x224xbf16>
    %15 = vector.shape_cast %14 : vector<1x8x224xbf16> to vector<8x224xbf16>
    %c2_19 = arith.constant 2 : index
    %c0_20 = arith.constant 0 : index
    %c0_21 = arith.constant 0 : index
    %16 = vector.load %arg2[%c2_19, %c0_20, %c0_21] : memref<9x8x8xbf16, #tpu.memory_space<vmem>>, vector<1x8x8xbf16>
    %17 = vector.shape_cast %16 : vector<1x8x8xbf16> to vector<8x8xbf16>
    %cst_22 = arith.constant dense<0.000000e+00> : vector<8x224xf32>
    %18 = tpu.matmul %17, %15, %cst_22 {dimension_numbers = #tpu.dot_dimension_numbers<[1], [0], [0], [1], [0, 0, 1, 1], [], []>} : vector<8x8xbf16>, vector<8x224xbf16>, vector<8x224xf32> -> vector<8x224xf32>
    %c0_23 = arith.constant 0 : index
    %c0_24 = arith.constant 0 : index
    %19 = vector.load %arg7[%c0_23, %c0_24] : memref<8x224xf32, #tpu.memory_space<vmem>>, vector<8x224xf32>
    %20 = arith.addf %19, %18 : vector<8x224xf32>
    %c0_25 = arith.constant 0 : index
    %c0_26 = arith.constant 0 : index
    %21 = vector.load %arg7[%c0_25, %c0_26] : memref<8x224xf32, #tpu.memory_space<vmem>>, vector<8x224xf32>
    tpu.vector_store %arg7[%c0_25, %c0_26], %20 {strides = array<i32>} : memref<8x224xf32, #tpu.memory_space<vmem>>, vector<8x224xf32>,
    %c0_27 = arith.constant 0 : index
    %c0_28 = arith.constant 0 : index
    %c16 = arith.constant 16 : index
    %22 = vector.load %arg1[%c0_27, %c0_28, %c16] : memref<1x8x384xbf16, #tpu.memory_space<vmem>>, vector<1x8x224xbf16>
    %23 = vector.shape_cast %22 : vector<1x8x224xbf16> to vector<8x224xbf16>
    %c3 = arith.constant 3 : index
    %c0_29 = arith.constant 0 : index
    %c0_30 = arith.constant 0 : index
    %24 = vector.load %arg2[%c3, %c0_29, %c0_30] : memref<9x8x8xbf16, #tpu.memory_space<vmem>>, vector<1x8x8xbf16>
    %25 = vector.shape_cast %24 : vector<1x8x8xbf16> to vector<8x8xbf16>
    %cst_31 = arith.constant dense<0.000000e+00> : vector<8x224xf32>
    %26 = tpu.matmul %25, %23, %cst_31 {dimension_numbers = #tpu.dot_dimension_numbers<[1], [0], [0], [1], [0, 0, 1, 1], [], []>} : vector<8x8xbf16>, vector<8x224xbf16>, vector<8x224xf32> -> vector<8x224xf32>
    %c0_32 = arith.constant 0 : index
    %c0_33 = arith.constant 0 : index
    %27 = vector.load %arg7[%c0_32, %c0_33] : memref<8x224xf32, #tpu.memory_space<vmem>>, vector<8x224xf32>
    %28 = arith.addf %27, %26 : vector<8x224xf32>
    %c0_34 = arith.constant 0 : index
    %c0_35 = arith.constant 0 : index
    %29 = vector.load %arg7[%c0_34, %c0_35] : memref<8x224xf32, #tpu.memory_space<vmem>>, vector<8x224xf32>
    tpu.vector_store %arg7[%c0_34, %c0_35], %28 {strides = array<i32>} : memref<8x224xf32, #tpu.memory_space<vmem>>, vector<8x224xf32>,
    %c0_36 = arith.constant 0 : index
    %c0_37 = arith.constant 0 : index
    %c17 = arith.constant 17 : index
    %30 = vector.load %arg1[%c0_36, %c0_37, %c17] : memref<1x8x384xbf16, #tpu.memory_space<vmem>>, vector<1x8x224xbf16>
    %31 = vector.shape_cast %30 : vector<1x8x224xbf16> to vector<8x224xbf16>
    %c4 = arith.constant 4 : index
    %c0_38 = arith.constant 0 : index
    %c0_39 = arith.constant 0 : index
    %32 = vector.load %arg2[%c4, %c0_38, %c0_39] : memref<9x8x8xbf16, #tpu.memory_space<vmem>>, vector<1x8x8xbf16>
    %33 = vector.shape_cast %32 : vector<1x8x8xbf16> to vector<8x8xbf16>
    %cst_40 = arith.constant dense<0.000000e+00> : vector<8x224xf32>
    %34 = tpu.matmul %33, %31, %cst_40 {dimension_numbers = #tpu.dot_dimension_numbers<[1], [0], [0], [1], [0, 0, 1, 1], [], []>} : vector<8x8xbf16>, vector<8x224xbf16>, vector<8x224xf32> -> vector<8x224xf32>
    %c0_41 = arith.constant 0 : index
    %c0_42 = arith.constant 0 : index
    %35 = vector.load %arg7[%c0_41, %c0_42] : memref<8x224xf32, #tpu.memory_space<vmem>>, vector<8x224xf32>
    %36 = arith.addf %35, %34 : vector<8x224xf32>
    %c0_43 = arith.constant 0 : index
    %c0_44 = arith.constant 0 : index
    %37 = vector.load %arg7[%c0_43, %c0_44] : memref<8x224xf32, #tpu.memory_space<vmem>>, vector<8x224xf32>
    tpu.vector_store %arg7[%c0_43, %c0_44], %36 {strides = array<i32>} : memref<8x224xf32, #tpu.memory_space<vmem>>, vector<8x224xf32>,
    %c0_45 = arith.constant 0 : index
    %c0_46 = arith.constant 0 : index
    %c18 = arith.constant 18 : index
    %38 = vector.load %arg1[%c0_45, %c0_46, %c18] : memref<1x8x384xbf16, #tpu.memory_space<vmem>>, vector<1x8x224xbf16>
    %39 = vector.shape_cast %38 : vector<1x8x224xbf16> to vector<8x224xbf16>
    %c5 = arith.constant 5 : index
    %c0_47 = arith.constant 0 : index
    %c0_48 = arith.constant 0 : index
    %40 = vector.load %arg2[%c5, %c0_47, %c0_48] : memref<9x8x8xbf16, #tpu.memory_space<vmem>>, vector<1x8x8xbf16>
    %41 = vector.shape_cast %40 : vector<1x8x8xbf16> to vector<8x8xbf16>
    %cst_49 = arith.constant dense<0.000000e+00> : vector<8x224xf32>
    %42 = tpu.matmul %41, %39, %cst_49 {dimension_numbers = #tpu.dot_dimension_numbers<[1], [0], [0], [1], [0, 0, 1, 1], [], []>} : vector<8x8xbf16>, vector<8x224xbf16>, vector<8x224xf32> -> vector<8x224xf32>
    %c0_50 = arith.constant 0 : index
    %c0_51 = arith.constant 0 : index
    %43 = vector.load %arg7[%c0_50, %c0_51] : memref<8x224xf32, #tpu.memory_space<vmem>>, vector<8x224xf32>
    %44 = arith.addf %43, %42 : vector<8x224xf32>
    %c0_52 = arith.constant 0 : index
    %c0_53 = arith.constant 0 : index
    %45 = vector.load %arg7[%c0_52, %c0_53] : memref<8x224xf32, #tpu.memory_space<vmem>>, vector<8x224xf32>
    tpu.vector_store %arg7[%c0_52, %c0_53], %44 {strides = array<i32>} : memref<8x224xf32, #tpu.memory_space<vmem>>, vector<8x224xf32>,
    %c0_54 = arith.constant 0 : index
    %c0_55 = arith.constant 0 : index
    %c32 = arith.constant 32 : index
    %46 = vector.load %arg1[%c0_54, %c0_55, %c32] : memref<1x8x384xbf16, #tpu.memory_space<vmem>>, vector<1x8x224xbf16>
    %47 = vector.shape_cast %46 : vector<1x8x224xbf16> to vector<8x224xbf16>
    %c6 = arith.constant 6 : index
    %c0_56 = arith.constant 0 : index
    %c0_57 = arith.constant 0 : index
    %48 = vector.load %arg2[%c6, %c0_56, %c0_57] : memref<9x8x8xbf16, #tpu.memory_space<vmem>>, vector<1x8x8xbf16>
    %49 = vector.shape_cast %48 : vector<1x8x8xbf16> to vector<8x8xbf16>
    %cst_58 = arith.constant dense<0.000000e+00> : vector<8x224xf32>
    %50 = tpu.matmul %49, %47, %cst_58 {dimension_numbers = #tpu.dot_dimension_numbers<[1], [0], [0], [1], [0, 0, 1, 1], [], []>} : vector<8x8xbf16>, vector<8x224xbf16>, vector<8x224xf32> -> vector<8x224xf32>
    %c0_59 = arith.constant 0 : index
    %c0_60 = arith.constant 0 : index
    %51 = vector.load %arg7[%c0_59, %c0_60] : memref<8x224xf32, #tpu.memory_space<vmem>>, vector<8x224xf32>
    %52 = arith.addf %51, %50 : vector<8x224xf32>
    %c0_61 = arith.constant 0 : index
    %c0_62 = arith.constant 0 : index
    %53 = vector.load %arg7[%c0_61, %c0_62] : memref<8x224xf32, #tpu.memory_space<vmem>>, vector<8x224xf32>
    tpu.vector_store %arg7[%c0_61, %c0_62], %52 {strides = array<i32>} : memref<8x224xf32, #tpu.memory_space<vmem>>, vector<8x224xf32>,
    %c0_63 = arith.constant 0 : index
    %c0_64 = arith.constant 0 : index
    %c33 = arith.constant 33 : index
    %54 = vector.load %arg1[%c0_63, %c0_64, %c33] : memref<1x8x384xbf16, #tpu.memory_space<vmem>>, vector<1x8x224xbf16>
    %55 = vector.shape_cast %54 : vector<1x8x224xbf16> to vector<8x224xbf16>
    %c7 = arith.constant 7 : index
    %c0_65 = arith.constant 0 : index
    %c0_66 = arith.constant 0 : index
    %56 = vector.load %arg2[%c7, %c0_65, %c0_66] : memref<9x8x8xbf16, #tpu.memory_space<vmem>>, vector<1x8x8xbf16>
    %57 = vector.shape_cast %56 : vector<1x8x8xbf16> to vector<8x8xbf16>
    %cst_67 = arith.constant dense<0.000000e+00> : vector<8x224xf32>
    %58 = tpu.matmul %57, %55, %cst_67 {dimension_numbers = #tpu.dot_dimension_numbers<[1], [0], [0], [1], [0, 0, 1, 1], [], []>} : vector<8x8xbf16>, vector<8x224xbf16>, vector<8x224xf32> -> vector<8x224xf32>
    %c0_68 = arith.constant 0 : index
    %c0_69 = arith.constant 0 : index
    %59 = vector.load %arg7[%c0_68, %c0_69] : memref<8x224xf32, #tpu.memory_space<vmem>>, vector<8x224xf32>
    %60 = arith.addf %59, %58 : vector<8x224xf32>
    %c0_70 = arith.constant 0 : index
    %c0_71 = arith.constant 0 : index
    %61 = vector.load %arg7[%c0_70, %c0_71] : memref<8x224xf32, #tpu.memory_space<vmem>>, vector<8x224xf32>
    tpu.vector_store %arg7[%c0_70, %c0_71], %60 {strides = array<i32>} : memref<8x224xf32, #tpu.memory_space<vmem>>, vector<8x224xf32>,
    %c0_72 = arith.constant 0 : index
    %c0_73 = arith.constant 0 : index
    %c34 = arith.constant 34 : index
    %62 = vector.load %arg1[%c0_72, %c0_73, %c34] : memref<1x8x384xbf16, #tpu.memory_space<vmem>>, vector<1x8x224xbf16>
    %63 = vector.shape_cast %62 : vector<1x8x224xbf16> to vector<8x224xbf16>
    %c8 = arith.constant 8 : index
    %c0_74 = arith.constant 0 : index
    %c0_75 = arith.constant 0 : index
    %64 = vector.load %arg2[%c8, %c0_74, %c0_75] : memref<9x8x8xbf16, #tpu.memory_space<vmem>>, vector<1x8x8xbf16>
    %65 = vector.shape_cast %64 : vector<1x8x8xbf16> to vector<8x8xbf16>
    %cst_76 = arith.constant dense<0.000000e+00> : vector<8x224xf32>
    %66 = tpu.matmul %65, %63, %cst_76 {dimension_numbers = #tpu.dot_dimension_numbers<[1], [0], [0], [1], [0, 0, 1, 1], [], []>} : vector<8x8xbf16>, vector<8x224xbf16>, vector<8x224xf32> -> vector<8x224xf32>
    %c0_77 = arith.constant 0 : index
    %c0_78 = arith.constant 0 : index
    %67 = vector.load %arg7[%c0_77, %c0_78] : memref<8x224xf32, #tpu.memory_space<vmem>>, vector<8x224xf32>
    %68 = arith.addf %67, %66 : vector<8x224xf32>
    %c0_79 = arith.constant 0 : index
    %c0_80 = arith.constant 0 : index
    %69 = vector.load %arg7[%c0_79, %c0_80] : memref<8x224xf32, #tpu.memory_space<vmem>>, vector<8x224xf32>
    tpu.vector_store %arg7[%c0_79, %c0_80], %68 {strides = array<i32>} : memref<8x224xf32, #tpu.memory_space<vmem>>, vector<8x224xf32>,
    %c0_81 = arith.constant 0 : index
    %c0_82 = arith.constant 0 : index
    %70 = vector.load %arg7[%c0_81, %c0_82] : memref<8x224xf32, #tpu.memory_space<vmem>>, vector<8x224xf32>
    %71 = arith.truncf %70 : vector<8x224xf32> to vector<8x224xbf16>
    %c0_83 = arith.constant 0 : index
    %c0_84 = arith.constant 0 : index
    %c0_85 = arith.constant 0 : index
    %72 = vector.load %arg4[%c0_83, %c0_84, %c0_85] : memref<1x8x224xbf16, #tpu.memory_space<vmem>>, vector<1x8x224xbf16>
    %73 = vector.shape_cast %72 : vector<1x8x224xbf16> to vector<8x224xbf16>
    %74 = vector.shape_cast %71 : vector<8x224xbf16> to vector<1x8x224xbf16>
    tpu.vector_store %arg4[%c0_83, %c0_84, %c0_85], %74 {strides = array<i32>} : memref<1x8x224xbf16, #tpu.memory_space<vmem>>, vector<1x8x224xbf16>,
    %c0_86 = arith.constant 0 : index
    %c0_87 = arith.constant 0 : index
    %75 = vector.load %arg3[%c0_86, %c0_87] : memref<1x224xf32, #tpu.memory_space<vmem>>, vector<1x224xf32>
    %76 = vector.broadcast %75 : vector<1x224xf32> to vector<8x224xf32>
    %77 = arith.mulf %70, %76 : vector<8x224xf32>
    %cst_88 = arith.constant dense<0.000000e+00> : vector<8xf32>
    %78 = vector.multi_reduction <add>, %77, %cst_88 [1] : vector<8x224xf32> to vector<8xf32>
    %79 = vector.shape_cast %78 : vector<8xf32> to vector<8x1xf32>
    %cst_89 = arith.constant 0.00510204071 : f32
    %80 = vector.broadcast %cst_89 : f32 to vector<8x1xf32>
    %81 = arith.mulf %79, %80 : vector<8x1xf32>
    %82 = vector.broadcast %81 : vector<8x1xf32> to vector<8x224xf32>
    %83 = arith.subf %70, %82 : vector<8x224xf32>
    %84 = vector.broadcast %75 : vector<1x224xf32> to vector<8x224xf32>
    %85 = arith.mulf %83, %84 : vector<8x224xf32>
    %86 = arith.mulf %85, %85 : vector<8x224xf32>
    %cst_90 = arith.constant dense<0.000000e+00> : vector<8xf32>
    %87 = vector.multi_reduction <add>, %86, %cst_90 [1] : vector<8x224xf32> to vector<8xf32>
    %88 = vector.shape_cast %87 : vector<8xf32> to vector<8x1xf32>
    %c0_91 = arith.constant 0 : index
    %c0_92 = arith.constant 0 : index
    %c0_93 = arith.constant 0 : index
    %89 = vector.load %arg5[%c0_91, %c0_92, %c0_93] : memref<1x8x1xf32, #tpu.memory_space<vmem>>, vector<1x8x1xf32>
    %90 = vector.shape_cast %89 : vector<1x8x1xf32> to vector<8x1xf32>
    %91 = vector.shape_cast %79 : vector<8x1xf32> to vector<1x8x1xf32>
    tpu.vector_store %arg5[%c0_91, %c0_92, %c0_93], %91 {strides = array<i32>} : memref<1x8x1xf32, #tpu.memory_space<vmem>>, vector<1x8x1xf32>,
    %c0_94 = arith.constant 0 : index
    %c0_95 = arith.constant 0 : index
    %c0_96 = arith.constant 0 : index
    %92 = vector.load %arg6[%c0_94, %c0_95, %c0_96] : memref<1x8x1xf32, #tpu.memory_space<vmem>>, vector<1x8x1xf32>
    %93 = vector.shape_cast %92 : vector<1x8x1xf32> to vector<8x1xf32>
    %94 = vector.shape_cast %88 : vector<8x1xf32> to vector<1x8x1xf32>
    tpu.vector_store %arg6[%c0_94, %c0_95, %c0_96], %94 {strides = array<i32>} : memref<1x8x1xf32, #tpu.memory_space<vmem>>, vector<1x8x1xf32>,
    return
  }
  func.func @transform_0(%arg0: i32) -> (i32, i32, i32) {
    %c0_i32 = arith.constant 0 : i32
    %c0_i32_0 = arith.constant 0 : i32
    %c0_i32_1 = arith.constant 0 : i32
    return %arg0, %c0_i32, %c0_i32_0 : i32, i32, i32
  }
  func.func @transform_1(%arg0: i32) -> (i32, i32, i32) {
    %c0_i32 = arith.constant 0 : i32
    %c0_i32_0 = arith.constant 0 : i32
    %c0_i32_1 = arith.constant 0 : i32
    %c0_i32_2 = arith.constant 0 : i32
    return %c0_i32, %c0_i32_0, %c0_i32_1 : i32, i32, i32
  }
  func.func @transform_2(%arg0: i32) -> (i32, i32) {
    %c0_i32 = arith.constant 0 : i32
    %c0_i32_0 = arith.constant 0 : i32
    %c0_i32_1 = arith.constant 0 : i32
    return %c0_i32, %c0_i32_0 : i32, i32
  }
  func.func @transform_3(%arg0: i32) -> (i32, i32, i32) {
    %c0_i32 = arith.constant 0 : i32
    %c0_i32_0 = arith.constant 0 : i32
    %c0_i32_1 = arith.constant 0 : i32
    return %arg0, %c0_i32, %c0_i32_0 : i32, i32, i32
  }
  func.func @transform_4(%arg0: i32) -> (i32, i32, i32) {
    %c0_i32 = arith.constant 0 : i32
    %c0_i32_0 = arith.constant 0 : i32
    %c0_i32_1 = arith.constant 0 : i32
    return %arg0, %c0_i32, %c0_i32_0 : i32, i32, i32
  }
  func.func @transform_5(%arg0: i32) -> (i32, i32, i32) {
    %c0_i32 = arith.constant 0 : i32
    %c0_i32_0 = arith.constant 0 : i32
    %c0_i32_1 = arith.constant 0 : i32
    return %arg0, %c0_i32, %c0_i32_0 : i32, i32, i32
  }
}

module attributes {stable_mosaic.version = 11 : i64} {
  func.func @_bn_relu_kernel(%arg0: i32, %arg1: memref<1x8x224xbf16, #tpu.memory_space<vmem>>, %arg2: memref<8x1xf32, #tpu.memory_space<vmem>>, %arg3: memref<8x1xf32, #tpu.memory_space<vmem>>, %arg4: memref<1x8x224xf32, #tpu.memory_space<vmem>>) attributes {dimension_semantics = [#tpu.dimension_semantics<parallel>], iteration_bounds = array<i64: 2>, scalar_prefetch = 0 : i64, scratch_operands = 0 : i64, tpu.core_type = #tpu.core_type<tc>, window_params = [{transform_indices = @transform_0, window_bounds = array<i64: 1, 8, 224>}, {pipeline_mode = #tpu.pipeline_mode<synchronous>, transform_indices = @transform_1, window_bounds = array<i64: 8, 1>}, {pipeline_mode = #tpu.pipeline_mode<synchronous>, transform_indices = @transform_2, window_bounds = array<i64: 8, 1>}, {transform_indices = @transform_3, window_bounds = array<i64: 1, 8, 224>}]} {
    %c0 = arith.constant 0 : index
    %c0_0 = arith.constant 0 : index
    %c0_1 = arith.constant 0 : index
    %0 = vector.load %arg1[%c0, %c0_0, %c0_1] : memref<1x8x224xbf16, #tpu.memory_space<vmem>>, vector<1x8x224xbf16>
    %1 = vector.shape_cast %0 : vector<1x8x224xbf16> to vector<8x224xbf16>
    %2 = arith.extf %1 : vector<8x224xbf16> to vector<8x224xf32>
    %c0_2 = arith.constant 0 : index
    %c0_3 = arith.constant 0 : index
    %3 = vector.load %arg2[%c0_2, %c0_3] : memref<8x1xf32, #tpu.memory_space<vmem>>, vector<8x1xf32>
    %4 = vector.broadcast %3 : vector<8x1xf32> to vector<8x224xf32>
    %5 = arith.mulf %2, %4 : vector<8x224xf32>
    %c0_4 = arith.constant 0 : index
    %c0_5 = arith.constant 0 : index
    %6 = vector.load %arg3[%c0_4, %c0_5] : memref<8x1xf32, #tpu.memory_space<vmem>>, vector<8x1xf32>
    %7 = vector.broadcast %6 : vector<8x1xf32> to vector<8x224xf32>
    %8 = arith.addf %5, %7 : vector<8x224xf32>
    %cst = arith.constant 0.000000e+00 : f32
    %9 = vector.broadcast %cst : f32 to vector<8x224xf32>
    %10 = arith.maximumf %8, %9 : vector<8x224xf32>
    %c0_6 = arith.constant 0 : index
    %c0_7 = arith.constant 0 : index
    %c0_8 = arith.constant 0 : index
    %11 = vector.load %arg4[%c0_6, %c0_7, %c0_8] : memref<1x8x224xf32, #tpu.memory_space<vmem>>, vector<1x8x224xf32>
    %12 = vector.shape_cast %11 : vector<1x8x224xf32> to vector<8x224xf32>
    %13 = vector.shape_cast %10 : vector<8x224xf32> to vector<1x8x224xf32>
    tpu.vector_store %arg4[%c0_6, %c0_7, %c0_8], %13 {strides = array<i32>} : memref<1x8x224xf32, #tpu.memory_space<vmem>>, vector<1x8x224xf32>,
    return
  }
  func.func @transform_0(%arg0: i32) -> (i32, i32, i32) {
    %c0_i32 = arith.constant 0 : i32
    %c0_i32_0 = arith.constant 0 : i32
    %c0_i32_1 = arith.constant 0 : i32
    return %arg0, %c0_i32, %c0_i32_0 : i32, i32, i32
  }
  func.func @transform_1(%arg0: i32) -> (i32, i32) {
    %c0_i32 = arith.constant 0 : i32
    %c0_i32_0 = arith.constant 0 : i32
    %c0_i32_1 = arith.constant 0 : i32
    return %c0_i32, %c0_i32_0 : i32, i32
  }
  func.func @transform_2(%arg0: i32) -> (i32, i32) {
    %c0_i32 = arith.constant 0 : i32
    %c0_i32_0 = arith.constant 0 : i32
    %c0_i32_1 = arith.constant 0 : i32
    return %c0_i32, %c0_i32_0 : i32, i32
  }
  func.func @transform_3(%arg0: i32) -> (i32, i32, i32) {
    %c0_i32 = arith.constant 0 : i32
    %c0_i32_0 = arith.constant 0 : i32
    %c0_i32_1 = arith.constant 0 : i32
    return %arg0, %c0_i32, %c0_i32_0 : i32, i32, i32
  }
}

</mosaic_0001>

<bundles_post_ra>
// kernel: conv_bn_relu_block.3
= control target key start
LH: loop header
LB: loop body
LE: loop exit
PB: predicated region body
PF: predicated region fallthrough
CT: control target
= control target key end

     0   :  { %s302_s12 = smov 0   ;;  %s325_s0 = inlined_call_operand.vmem [shape: bf16[2,8,224], index: 0, kind: input, shape index: {}]   ;;  %s326_s1 = inlined_call_operand.vmem [shape: f32[8,1], index: 1, kind: input, shape index: {}]   ;;  %s327_s2 = inlined_call_operand.vmem [shape: f32[8,1], index: 2, kind: input, shape index: {}]   ;;  %s328_s3 = inlined_call_operand.vmem [shape: f32[2,8,224], index: 3, kind: output, shape index: {}]  }
   0x1 LB: > { %s250_s13 = sadd.s32 4294967295, %s279_s12   ;;  %p254_p0 = scmp.ge.s32.totalorder %s279_s12, 1  ;;  %s279_s12 = sphi %s302_s12, %s13_s12  }
   0x2   : > { %p137_p1 = scmp.lt.s32.totalorder %s279_s12, 3 }
   0x4   : > { %p138_p2 = pnand %p254_p0, %p137_p1 }
   0x5   : > { %p161_p3 = scmp.lt.s32.totalorder (!%p138_p2), %s250_s13, 1 }
   0x6   : > { %141 = sbr.rel (%p138_p2) target bundleno = 146 (0x92), region = 32 }
   0xb   : > { %v174_v0 = vld [vmem:[%s326_s1] sm:$0xff]  ;;  %v281_v1 = vmov 0   ;;  %s330_s13 = smov (!%p161_p3, %s250_s13), 1  ;;  %vm193_vm0 = vcmask 785408  }
   0xc   : > { %272 = vset.pattern.permute.xlu0 %v281_v1  ;;  %v182_v2 = vld [vmem:[%s327_s2] sm:$0xff]  ;;  %s261_s18 = sshll.u32 %s330_s13, 3  ;;  %s262_s22 = sshll.u32 %s330_s13, 4 }
   0xd   : > { %177 = vperm.xlu0 %272, %v174_v0   ;;  %s165_s21 = scalar_lea.vmem %s325_s0, %s261_s18  ;;  %s170_s25 = scalar_lea.vmem %s328_s3, %s262_s22 }
   0xe   : > { %v171_v3 = vld [vmem:[%s165_s21] sm:$0xff] }
   0xf   : > { %v172_v4 = vunpack.c.l.bf16 %v171_v3  ;;  %v173_v5 = vunpack.c.h.bf16 %v171_v3 }
  0x11   : > { %185 = vperm.xlu0 %272, %v182_v2  }
  0x88   : > { %v178_v6 = vpop.permute.xlu0 %177 }
  0x89   : > { %v180_v7 = vmul.f32 %v178_v6, %v172_v4  ;;  %v181_v8 = vmul.f32 %v178_v6, %v173_v5 }
  0x8c   : > { %v186_v9 = vpop.permute.xlu0 %185 }
  0x8d   : > { %v188_v10 = vadd.f32 %v186_v9, %v180_v7  ;;  %v189_v11 = vadd.f32 %v186_v9, %v181_v8 }
  0x8f   : > { %v190_v12 = vmax.f32 %v188_v10, 0.0  ;;  %v191_v13 = vmax.f32 %v189_v11, 0.0 }
  0x91   : > { %192 = vst [vmem:[%s170_s25] sm:$0xff] %v190_v12  ;;  %194 = vst.msk [vmem:[%s170_s25 + $0x8] sm:$0xff] %vm193_vm0, %v191_v13 }
  0x92 PF: > { %s13_s12 = sadd.s32 1, %s279_s12  }
  0x93   : > { %p10_p4 = scmp.ge.s32.totalorder %s13_s12, 4  }
  0x95   :  { %12 = sbr.rel (!%p10_p4) target bundleno = 1 (0x1), region = 62 }

// kernel: conv_bn_relu_block.2
= control target key start
LH: loop header
LB: loop body
LE: loop exit
PB: predicated region body
PF: predicated region fallthrough
CT: control target
= control target key end

     0   :  { %s1175_s18 = smov 0   ;;  %s1291_s0 = inlined_call_operand.vmem [shape: bf16[2,8,384], index: 0, kind: input, shape index: {}]   ;;  %s1292_s1 = inlined_call_operand.vmem [shape: bf16[9,8,8], index: 1, kind: input, shape index: {}]   ;;  %s1293_s2 = inlined_call_operand.vmem [shape: f32[1,224], index: 2, kind: input, shape index: {}]   ;;  %s1294_s3 = inlined_call_operand.vmem [shape: bf16[2,8,224], index: 3, kind: output, shape index: {0}]   ;;  %s1295_s4 = inlined_call_operand.vmem [shape: f32[2,8,1], index: 4, kind: output, shape index: {1}]   ;;  %s1296_s5 = inlined_call_operand.vmem [shape: f32[2,8,1], index: 5, kind: output, shape index: {2}]  }
   0x1 LB: > { %s1045_s19 = sadd.s32 4294967295, %s1134_s18   ;;  %p1049_p0 = scmp.ge.s32.totalorder %s1134_s18, 1  ;;  %s1134_s18 = sphi %s1175_s18, %s16_s18  }
   0x2   : > { %p192_p1 = scmp.lt.s32.totalorder %s1134_s18, 3 }
   0x4   : > { %p193_p2 = pnand %p1049_p0, %p192_p1 }
   0x5   : > { %p228_p3 = scmp.lt.s32.totalorder (!%p193_p2), %s1045_s19, 1  ;;  %s1137_s24 = smov (!%p193_p2), 127  }
   0x6   : > { %196 = sbr.rel (%p193_p2) target bundleno = 710 (0x2c6), region = 32  ;;  %s1138_s25 = smov (!%p193_p2), 126  }
   0x7   : > { %s1139_s28 = smov (!%p193_p2), 112   ;;  %s1140_s29 = smov (!%p193_p2), 111  }
   0x8   : > { %s1141_s30 = smov (!%p193_p2), 110   ;;  %s1142_s6 = smov (!%p193_p2), 96  }
   0x9   : > { %s1143_s7 = smov (!%p193_p2), 95   ;;  %s1144_s8 = smov (!%p193_p2), 94  }
   0xb   : > { %v1136_v0 = vmov 0   ;;  %s1298_s19 = smov (!%p228_p3, %s1045_s19), 1  ;;  %vm258_vm0 = vcmask 1043456   ;;  %v248_v5 = vld [vmem:[%s1292_s1] sm:$0xf]  ;;  %vm254_vm1 = vcmask 64512  }
   0xc   : > { %297 = vmatprep.mubr.bf16.mxu0 %v1136_v0  ;;  %364 = vmatprep.mubr.bf16.mxu1 %v1136_v0  ;;  %s1106_s20 = smul.u32 12, %s1298_s19  ;;  %vm391_vm2 = vcmask 1031168   ;;  %vm321_vm3 = vcmask 1039360   ;;  %vm461_vm4 = vcmask 916480   ;;  %v1059_v16 = vld [vmem:[%s1292_s1 + $0x4] sm:$0xf] }
   0xd   : > { %v1064_v17 = vld [vmem:[%s1292_s1 + $0x8] sm:$0xf]  ;;  %vm531_vm5 = vcmask 908288   ;;  %vm601_vm6 = vcmask 900096   ;;  %v1069_v26 = vld [vmem:[%s1292_s1 + $0xc] sm:$0xf] }
   0xe   : > { %s1191_s23 = scalar_lea.vmem %s1291_s0, %s1106_s20  ;;  %v1074_v27 = vld [vmem:[%s1292_s1 + $0x10] sm:$0xf]  ;;  %vm307_vm7 = vcmask 785408   ;;  %vm747_vm8 = vcmask 777216   ;;  %v1079_v36 = vld [vmem:[%s1292_s1 + $0x14] sm:$0xf] }
   0xf   : > { %v309_v1 = vld [vmem:[%s1191_s23] sm:$0xff]  ;;  %v1126_v6 = vld [vmem:[%s1191_s23 + $0x8] ss:$0 sps:$4 sm:$0xff]   ;;  %v1084_v37 = vld [vmem:[%s1292_s1 + $0x18] sm:$0xf]  ;;  %vm824_vm9 = vcmask 769024  }
  0x10   : > { %v1060_v2 = vcombine.low %v309_v1, %v309_v1  ;;  %v1061_v3 = vcombine.high %v309_v1, %v309_v1  ;;  %v1127_v7 = vld [vmem:[%s1191_s23 + $0x8] ss:$0 sps:$4 sm:$0xff]   ;;  %v1089_v45 = vld [vmem:[%s1292_s1 + $0x1c] sm:$0xf]  ;;  %v1095_v51 = vld [vmem:[%s1292_s1 + $0x20] sm:$0xf] }
  0x11   : > { %vm893_vm10 = vcmask 785412   ;;  %vm925_vm12 = vcmask 7168  }
  0x12   : > { %317 = vrot.lane.b32.xlu0 %v1060_v2, %s1137_s24  ;;  %387 = vrot.lane.b32.xlu1 %v1060_v2, %s1138_s25  ;;  %v260_v4 = vsel %vm258_vm0, %v1060_v2, 0  ;;  %vm894_vm11 = vmor %vm893_vm10, %vm258_vm0 }
  0x13   : > { %1057 = vmatprep.subr.msk.bf16.mxu0 %vm258_vm0, %v1061_v3 }
  0x14   : > { %280 = vmatpush1.bf16.msra.mxu0 %v260_v4 }
  0x16   : > { %319 = vrot.lane.b32.xlu0 %v1061_v3, %s1137_s24  ;;  %389 = vrot.lane.b32.xlu1 %v1061_v3, %s1138_s25 }
  0x17   : > { %1058 = vmatmul.mubr.msk.bf16.vlgmr.msra.gmra.mxu0 %vm254_vm1, %v248_v5 }
  0x18   : > { %434 = vmatprep.mubr.bf16.mxu0 %v1136_v0 }
  0x1a   : > { %459 = vrot.lane.b32.xlu1 %v1061_v3, %s1139_s28  ;;  %457 = vrot.lane.b32.xlu0 %v1060_v2, %s1139_s28 }
  0x1e   : > { %529 = vrot.lane.b32.xlu1 %v1061_v3, %s1140_s29  ;;  %527 = vrot.lane.b32.xlu0 %v1060_v2, %s1140_s29  ;;  %s1271_s29 = sshll.u32 %s1298_s19, 3 }
  0x1f   : > { %s241_s9 = scalar_lea.vmem %s1295_s4, %s1271_s29  ;;  %s245_s12 = scalar_lea.vmem %s1296_s5, %s1271_s29 }
  0x22   : > { %599 = vrot.lane.b32.xlu1 %v1061_v3, %s1141_s30  ;;  %597 = vrot.lane.b32.xlu0 %v1060_v2, %s1141_s30 }
  0x26   : > { %667 = vrot.lane.b32.xlu0 %v1060_v2, %s1142_s6  ;;  %669 = vrot.lane.b32.xlu1 %v1061_v3, %s1142_s6 }
  0x2a   : > { %741 = vrot.lane.b32.xlu0 %v1060_v2, %s1143_s7  ;;  %743 = vrot.lane.b32.xlu1 %v1061_v3, %s1143_s7 }
  0x2e   : > { %745 = vrot.lane.b32.xlu0 %v1126_v6, %s1143_s7  ;;  %818 = vrot.lane.b32.xlu1 %v1060_v2, %s1144_s8  ;;  %s237_s7 = scalar_lea.vmem %s1294_s3, %s1271_s29 }
  0x32   : > { %822 = vrot.lane.b32.xlu1 %v1127_v7, %s1144_s8  ;;  %820 = vrot.lane.b32.xlu0 %v1061_v3, %s1144_s8 }
  0x84   : > { %v318_v8 = vpop.permute.xlu0 %317  ;;  %v388_v9 = vpop.permute.xlu1 %387 }
  0x88   : > { %v320_v10 = vpop.permute.xlu0 %319  ;;  %v390_v11 = vpop.permute.xlu1 %389 }
  0x89   : > { %v392_v12 = vsel %vm391_vm2, %v388_v9, %v390_v11  ;;  %1062 = vmatprep.subr.msk.bf16.mxu1 %vm258_vm0, %v320_v10  ;;  %v322_v13 = vsel %vm321_vm3, %v318_v8, %v320_v10  ;;  %1067 = vmatprep.subr.msk.bf16.mxu0 %vm258_vm0, %v390_v11 }
  0x8a   : > { %v397_v14 = vsel %vm258_vm0, %v392_v12, 0  ;;  %v327_v15 = vsel %vm258_vm0, %v322_v13, 0 }
  0x8b   : > { %347 = vmatpush1.bf16.msra.mxu1 %v327_v15  ;;  %417 = vmatpush1.bf16.msra.mxu0 %v397_v14 }
  0x8c   : > { %v460_v18 = vpop.permute.xlu1 %459  ;;  %v458_v19 = vpop.permute.xlu0 %457 }
  0x8d   : > { %v462_v20 = vsel %vm461_vm4, %v458_v19, %v460_v18  ;;  %1072 = vmatprep.subr.msk.bf16.mxu1 %vm258_vm0, %v460_v18 }
  0x8e   : > { %1063 = vmatmul.mubr.msk.bf16.vlgmr.msra.gmra.mxu1 %vm254_vm1, %v1059_v16  ;;  %1068 = vmatmul.mubr.msk.bf16.vlgmr.msra.gmra.mxu0 %vm254_vm1, %v1064_v17  ;;  %v467_v21 = vsel %vm258_vm0, %v462_v20, 0 }
  0x8f   : > { %487 = vmatpush1.bf16.msra.mxu1 %v467_v21  ;;  %504 = vmatprep.mubr.bf16.mxu1 %v1136_v0 }
  0x90   : > { %v530_v22 = vpop.permute.xlu1 %529  ;;  %v528_v23 = vpop.permute.xlu0 %527  ;;  %574 = vmatprep.mubr.bf16.mxu0 %v1136_v0 }
  0x91   : > { %v532_v24 = vsel %vm531_vm5, %v528_v23, %v530_v22  ;;  %1077 = vmatprep.subr.msk.bf16.mxu0 %vm258_vm0, %v530_v22 }
  0x92   : > { %v537_v25 = vsel %vm258_vm0, %v532_v24, 0 }
  0x93   : > { %557 = vmatpush1.bf16.msra.mxu0 %v537_v25 }
  0x94   : > { %v600_v28 = vpop.permute.xlu1 %599  ;;  %v598_v29 = vpop.permute.xlu0 %597 }
  0x95   : > { %v602_v30 = vsel %vm601_vm6, %v598_v29, %v600_v28  ;;  %1082 = vmatprep.subr.msk.bf16.mxu1 %vm258_vm0, %v600_v28 }
  0x96   : > { %1073 = vmatmul.mubr.msk.bf16.vlgmr.msra.gmra.mxu1 %vm254_vm1, %v1069_v26  ;;  %1078 = vmatmul.mubr.msk.bf16.vlgmr.msra.gmra.mxu0 %vm254_vm1, %v1074_v27  ;;  %v607_v31 = vsel %vm258_vm0, %v602_v30, 0 }
  0x97   : > { %627 = vmatpush1.bf16.msra.mxu1 %v607_v31  ;;  %644 = vmatprep.mubr.bf16.mxu1 %v1136_v0 }
  0x98   : > { %v668_v32 = vpop.permute.xlu0 %667  ;;  %v670_v33 = vpop.permute.xlu1 %669  ;;  %714 = vmatprep.mubr.bf16.mxu0 %v1136_v0 }
  0x99   : > { %v672_v34 = vsel %vm307_vm7, %v668_v32, %v670_v33  ;;  %1087 = vmatprep.subr.msk.bf16.mxu0 %vm258_vm0, %v670_v33 }
  0x9a   : > { %v677_v35 = vsel %vm258_vm0, %v672_v34, 0 }
  0x9b   : > { %697 = vmatpush1.bf16.msra.mxu0 %v677_v35 }
  0x9c   : > { %v742_v38 = vpop.permute.xlu0 %741  ;;  %v744_v39 = vpop.permute.xlu1 %743 }
  0x9d   : > { %v748_v40 = vsel %vm747_vm8, %v742_v38, %v744_v39 }
  0x9e   : > { %1083 = vmatmul.mubr.msk.bf16.vlgmr.msra.gmra.mxu1 %vm254_vm1, %v1079_v36  ;;  %1088 = vmatmul.mubr.msk.bf16.vlgmr.msra.gmra.mxu0 %vm254_vm1, %v1084_v37  ;;  %v754_v41 = vsel %vm258_vm0, %v748_v40, 0 }
  0x9f   : > { %791 = vmatprep.mubr.bf16.mxu1 %v1136_v0  ;;  %868 = vmatprep.mubr.bf16.mxu0 %v1136_v0 }
  0xa0   : > { %v746_v42 = vpop.permute.xlu0 %745  ;;  %v819_v43 = vpop.permute.xlu1 %818 }
  0xa1   : > { %v749_v44 = vsel %vm747_vm8, %v744_v39, %v746_v42 }
  0xa2   : > { %1093 = vmatprep.subr.msk.bf16.mxu1 %vm258_vm0, %v749_v44 }
  0xa3   : > { %774 = vmatpush1.bf16.msra.mxu1 %v754_v41 }
  0xa4   : > { %v823_v46 = vpop.permute.xlu1 %822  ;;  %v821_v47 = vpop.permute.xlu0 %820 }
  0xa5   : > { %v825_v48 = vsel %vm824_vm9, %v819_v43, %v821_v47  ;;  %v826_v49 = vsel %vm824_vm9, %v821_v47, %v823_v46  ;;  %v898_v46 = vlaneseq }
  0xa6   : > { %1094 = vmatmul.mubr.msk.bf16.vlgmr.msra.gmra.mxu1 %vm254_vm1, %v1089_v45  ;;  %v831_v50 = vsel %vm258_vm0, %v825_v48, 0  ;;  %1099 = vmatprep.subr.msk.bf16.mxu0 %vm258_vm0, %v826_v49 }
  0xa7   : > { %851 = vmatpush1.bf16.msra.mxu0 %v831_v50  ;;  %v899_v48 = vshrl.u32 %v898_v46, 7 }
  0xa9   : > { %v904_v50 = vsub.s32 1, %v899_v48 }
  0xaa   : > { %1100 = vmatmul.mubr.msk.bf16.vlgmr.msra.gmra.mxu0 %vm254_vm1, %v1095_v51  ;;  %v900_v51 = vsub.s32 0, %v899_v48 }
  0xd7   : > { %v299_v52 = vpop.f32.mrf.mxu0 }
  0xd9   : > { %v301_v53 = vpop.f32.mrf.mxu0 }
  0xda   : > { %308 = vst.msk [vmem:[#allocation2 + $0x8] sm:$0xff] %vm307_vm7, %v301_v53 }
  0xdb   : > { %v303_v54 = vpop.f32.mrf.mxu0 }
  0xdd   : > { %v304_v55 = vpop.f32.mrf.mxu0 }
  0xe1   : > { %v374_v59 = vld [vmem:[#allocation2 + $0x8] sm:$0xff] }
 0x14e   : > { %v366_v56 = vpop.f32.mrf.mxu1  ;;  %v436_v57 = vpop.f32.mrf.mxu0 }
 0x14f   : > { %v375_v4 = vadd.f32 %v366_v56, %v299_v52  ;;  %v896_v52 = vld [vmem:[%s1293_s2] sm:$0x3] }
 0x150   : > { %v368_v58 = vpop.f32.mrf.mxu1  ;;  %v438_v60 = vpop.f32.mrf.mxu0  ;;  %v905_v53 = vrot.slane %v896_v52, %v904_v50  ;;  %v901_v54 = vrot.slane %v896_v52, %v900_v51 }
 0x151   : > { %v376_v61 = vadd.f32 %v374_v59, %v368_v58  ;;  %v445_v10 = vadd.f32 %v436_v57, %v375_v4 }
 0x152   : > { %v370_v62 = vpop.f32.mrf.mxu1  ;;  %v440_v63 = vpop.f32.mrf.mxu0 }
 0x153   : > { %378 = vst.msk [vmem:[#allocation2 + $0x8] sm:$0xff] %vm307_vm7, %v376_v61 }
 0x154   : > { %v371_v0 = vpop.f32.mrf.mxu1  ;;  %v441_v1 = vpop.f32.mrf.mxu0 }
 0x156   : > { %v506_v2 = vpop.f32.mrf.mxu1  ;;  %v576_v3 = vpop.f32.mrf.mxu0 }
 0x157   : > { %v515_v14 = vadd.f32 %v506_v2, %v445_v10 }
 0x158   : > { %v508_v5 = vpop.f32.mrf.mxu1  ;;  %v578_v6 = vpop.f32.mrf.mxu0 }
 0x159   : > { %v585_v19 = vadd.f32 %v576_v3, %v515_v14 }
 0x15a   : > { %v444_v7 = vld [vmem:[#allocation2 + $0x8] sm:$0xff]  ;;  %v510_v8 = vpop.f32.mrf.mxu1  ;;  %v580_v9 = vpop.f32.mrf.mxu0 }
 0x15b   : > { %v446_v11 = vadd.f32 %v444_v7, %v438_v60 }
 0x15c   : > { %v511_v12 = vpop.f32.mrf.mxu1  ;;  %v581_v13 = vpop.f32.mrf.mxu0 }
 0x15d   : > { %448 = vst.msk [vmem:[#allocation2 + $0x8] sm:$0xff] %vm307_vm7, %v446_v11 }
 0x15e   : > { %v646_v15 = vpop.f32.mrf.mxu1  ;;  %v716_v16 = vpop.f32.mrf.mxu0 }
 0x15f   : > { %v655_v22 = vadd.f32 %v646_v15, %v585_v19 }
 0x160   : > { %v648_v17 = vpop.f32.mrf.mxu1  ;;  %v718_v18 = vpop.f32.mrf.mxu0 }
 0x161   : > { %v725_v28 = vadd.f32 %v716_v16, %v655_v22 }
 0x162   : > { %v650_v20 = vpop.f32.mrf.mxu1  ;;  %v720_v21 = vpop.f32.mrf.mxu0 }
 0x164   : > { %v514_v23 = vld [vmem:[#allocation2 + $0x8] sm:$0xff]  ;;  %v651_v24 = vpop.f32.mrf.mxu1  ;;  %v721_v25 = vpop.f32.mrf.mxu0 }
 0x165   : > { %v516_v26 = vadd.f32 %v514_v23, %v508_v5 }
 0x166   : > { %v793_v27 = vpop.f32.mrf.mxu1 }
 0x167   : > { %518 = vst.msk [vmem:[#allocation2 + $0x8] sm:$0xff] %vm307_vm7, %v516_v26  ;;  %v802_v30 = vadd.f32 %v793_v27, %v725_v28 }
 0x168   : > { %v795_v29 = vpop.f32.mrf.mxu1 }
 0x16a   : > { %v797_v31 = vpop.f32.mrf.mxu1  ;;  %v870_v32 = vpop.f32.mrf.mxu0 }
 0x16b   : > { %v879_v33 = vadd.f32 %v870_v32, %v802_v30 }
 0x16c   : > { %v798_v34 = vpop.f32.mrf.mxu1  ;;  %v872_v35 = vpop.f32.mrf.mxu0 }
 0x16d   : > { %v908_v58 = vmul.f32 %v901_v54, %v879_v33 }
 0x16e   : > { %v584_v36 = vld [vmem:[#allocation2 + $0x8] sm:$0xff]  ;;  %v874_v37 = vpop.f32.mrf.mxu0 }
 0x16f   : > { %v586_v38 = vadd.f32 %v584_v36, %v578_v6 }
 0x170   : > { %v875_v39 = vpop.f32.mrf.mxu0 }
 0x171   : > { %588 = vst.msk [vmem:[#allocation2 + $0x8] sm:$0xff] %vm307_vm7, %v586_v38 }
 0x178   : > { %v654_v40 = vld [vmem:[#allocation2 + $0x8] sm:$0xff] }
 0x179   : > { %v656_v41 = vadd.f32 %v654_v40, %v648_v17 }
 0x17b   : > { %658 = vst.msk [vmem:[#allocation2 + $0x8] sm:$0xff] %vm307_vm7, %v656_v41 }
 0x182   : > { %v724_v42 = vld [vmem:[#allocation2 + $0x8] sm:$0xff] }
 0x183   : > { %v726_v43 = vadd.f32 %v724_v42, %v718_v18 }
 0x185   : > { %728 = vst.msk [vmem:[#allocation2 + $0x8] sm:$0xff] %vm307_vm7, %v726_v43 }
 0x18c   : > { %v801_v44 = vld [vmem:[#allocation2 + $0x8] sm:$0xff] }
 0x18d   : > { %v803_v45 = vadd.f32 %v801_v44, %v795_v29 }
 0x18f   : > { %805 = vst.msk [vmem:[#allocation2 + $0x8] sm:$0xff] %vm307_vm7, %v803_v45 }
 0x196   : > { %v878_v47 = vld [vmem:[#allocation2 + $0x8] sm:$0xff] }
 0x197   : > { %v880_v49 = vadd.f32 %v878_v47, %v872_v35 }
 0x199   : > { %882 = vst.msk [vmem:[#allocation2 + $0x8] sm:$0xff] %vm307_vm7, %v880_v49 }
 0x1a0   : > { %v884_v55 = vld [vmem:[#allocation2 + $0x8] sm:$0xff] }
 0x1a1   : > { %v909_v56 = vmul.f32 %v905_v53, %v884_v55  ;;  %v1105_v57 = vpack.c.bf16 %v884_v55, %v879_v33 }
 0x1a3   : > { %v910_v59 = vsel %vm307_vm7, %v909_v56, 0.0  ;;  %895 = vst.msk [vmem:[%s237_s7] sm:$0xff] %vm894_vm11, %v1105_v57 }
 0x1a4   : > { %v911_v60 = vadd.f32 %v910_v59, %v908_v58 }
 0x1a6   : > { %912 = vadd.xlane.f32.xlu0 %v911_v60 }
 0x22f   : > { %v913_v61 = vpop.xlane.xlu0 %912 }
 0x230   : > { %v914_v62 = vmul.f32 0.0051020407, %v913_v61  ;;  %926 = vst.msk [vmem:[%s241_s9] sm:$0xff] %vm925_vm12, %v913_v61 }
 0x232   : > { %v915_v63 = vsub.f32 %v879_v33, %v914_v62  ;;  %v916_v0 = vsub.f32 %v884_v55, %v914_v62 }
 0x234   : > { %v918_v1 = vmul.f32 %v916_v0, %v905_v53  ;;  %v917_v2 = vmul.f32 %v915_v63, %v901_v54 }
 0x236   : > { %v919_v3 = vmul.f32 %v917_v2, %v917_v2  ;;  %v920_v4 = vmul.f32 %v918_v1, %v918_v1 }
 0x238   : > { %v921_v5 = vsel %vm307_vm7, %v920_v4, 0.0 }
 0x239   : > { %v922_v6 = vadd.f32 %v921_v5, %v919_v3 }
 0x23b   : > { %923 = vadd.xlane.f32.xlu1 %v922_v6 }
 0x2c4   : > { %v924_v7 = vpop.xlane.xlu1 %923 }
 0x2c5   : > { %927 = vst.msk [vmem:[%s245_s12] sm:$0xff] %vm925_vm12, %v924_v7 }
 0x2c6 PF: > { %s16_s18 = sadd.s32 1, %s1134_s18  }
 0x2c7   : > { %p13_p4 = scmp.ge.s32.totalorder %s16_s18, 4  }
 0x2c9   :  { %15 = sbr.rel (!%p13_p4) target bundleno = 1 (0x1), region = 94 }

</bundles_post_ra>
